<compile_context>
chip_gen: v5e
topology: v5e:2x2
jax: 0.10.0
libtpu: 0.0.40
codegen_flags: <defaults>
</compile_context>

<pallas_src>
import functools

import jax
import jax.numpy as jnp
from jax.experimental import pallas as pl
from jax.experimental.pallas import tpu as pltpu


def _round_up(n, m):
    return ((n + m - 1) // m) * m


# -----------------------------------------------------------------------------
# Fused kernel: entire 6-layer forward pass on one batch tile
# -----------------------------------------------------------------------------
def _alzeimer_fused_kernel(x_ref,
                           w1_ref, b1_ref, w2_ref, b2_ref, w3_ref, b3_ref,
                           w4_ref, b4_ref, w5_ref, b5_ref, w6_ref, b6_ref,
                           o_ref, *, neg_slope):
    # Hidden block: Linear -> BatchNorm1d(eval, pre-folded into W/b) ->
    # LeakyReLU(neg_slope) -> Dropout (identity in eval mode).
    # TODO(synk): training-mode dropout / BN batch statistics not implemented.
    def hidden(h, w_ref, b_ref):
        y = jnp.dot(h, w_ref[...], preferred_element_type=jnp.float32)
        y = y + b_ref[...]
        y = jnp.maximum(y, neg_slope * y)       # LeakyReLU (valid: 0 < slope < 1)
        return y.astype(jnp.bfloat16)           # bf16 feed to next MXU op

    h = x_ref[...].astype(jnp.bfloat16)         # in-kernel cast (no wrapper pass)
    h = hidden(h, w1_ref, b1_ref)
    h = hidden(h, w2_ref, b2_ref)
    h = hidden(h, w3_ref, b3_ref)
    h = hidden(h, w4_ref, b4_ref)
    h = hidden(h, w5_ref, b5_ref)

    # Final Linear (lane-padded to 128 cols) -> exact Sigmoid.  exp goes to the
    # EUP; the (tb, 128) store is lane-dense (unmasked vst).
    y = jnp.dot(h, w6_ref[...], preferred_element_type=jnp.float32) + b6_ref[...]
    o_ref[...] = 1.0 / (1.0 + jnp.exp(-y))


# -----------------------------------------------------------------------------
# Wrapper (jit'ed): builds specs, launches one pallas_call, slices real f_out
# -----------------------------------------------------------------------------
@functools.partial(jax.jit,
                   static_argnames=("neg_slope", "max_tile", "features_out"))
def alzeimer_forward(x, weights, biases, *, neg_slope=0.1, max_tile=1024,
                     features_out=1):
    B, f_in = x.shape
    f_out_pad = weights[-1].shape[1]            # lane-padded (multiple of 128)

    # Batch tile: aim for multiples of 256 and at least 2 grid steps for large
    # batches (so the "parallel" axis shards across both v7x TensorCores), but
    # never larger than the (sublane-rounded) batch itself.
    tb = min(max_tile, _round_up(pl.cdiv(B, 2), 256))
    tb = min(tb, _round_up(B, 8))
    grid = (pl.cdiv(B, tb),)                    # ragged last block handled by Pallas

    x_spec = pl.BlockSpec((tb, f_in), lambda i: (i, 0))
    out_spec = pl.BlockSpec((tb, f_out_pad), lambda i: (i, 0))

    # Weights/biases stay resident across batch tiles (constant index_map).
    # (Single-buffering them would save ~0.5 MB VMEM but is unnecessary here.)
    param_specs = []
    operands = []
    for w, b in zip(weights, biases):
        param_specs.append(pl.BlockSpec(w.shape, lambda i: (0, 0)))
        param_specs.append(pl.BlockSpec(b.shape, lambda i: (0, 0)))
        operands.extend([w, b])

    flops = 2 * B * sum(int(w.shape[0]) * int(w.shape[1]) for w in weights)
    param_bytes = sum(int(w.size) * w.dtype.itemsize for w in weights) + \
                  sum(int(b.size) * b.dtype.itemsize for b in biases)
    cost = pl.CostEstimate(
        flops=int(flops),
        transcendentals=int(B * f_out_pad),
        bytes_accessed=int(B * f_in * x.dtype.itemsize
                           + B * f_out_pad * 4
                           + param_bytes),
    )

    out = pl.pallas_call(
        functools.partial(_alzeimer_fused_kernel, neg_slope=neg_slope),
        out_shape=jax.ShapeDtypeStruct((B, f_out_pad), jnp.float32),
        grid=grid,
        in_specs=[x_spec] + param_specs,
        out_specs=out_spec,
        cost_estimate=cost,
        compiler_params=pltpu.CompilerParams(
            dimension_semantics=("parallel",)),
    )(x, *operands)

    return out[:, :features_out]


# -----------------------------------------------------------------------------
# Parameter construction (deterministic, mirrors nn.Module __init__ shapes),
# with BatchNorm (eval) folded into each hidden layer's W / b, and the final
# layer zero-padded to 128 output columns for lane-dense stores.
# -----------------------------------------------------------------------------
def init_params(key, features_in, h1=256, h2=128, h3=64, h4=32,
                features_out=1, eps=1e-5):
    dims = [(features_in, h1), (h1, h1), (h1, h2), (h2, h3), (h3, h4),
            (h4, features_out)]
    weights, biases = [], []
    for layer_idx, (fin, fout) in enumerate(dims):
        key, kw, kb = jax.random.split(key, 3)
        # PyTorch Linear default init: U(-1/sqrt(fin), 1/sqrt(fin)).
        bound = 1.0 / (fin ** 0.5)
        w = jax.random.uniform(kw, (fin, fout), jnp.float32, -bound, bound)
        b = jax.random.uniform(kb, (fout,), jnp.float32, -bound, bound)

        if layer_idx < 5:
            # BatchNorm1d defaults: gamma=1, beta=0, running_mean=0, running_var=1.
            gamma = jnp.ones((fout,), jnp.float32)
            beta = jnp.zeros((fout,), jnp.float32)
            running_mean = jnp.zeros((fout,), jnp.float32)
            running_var = jnp.ones((fout,), jnp.float32)
            scale = gamma / jnp.sqrt(running_var + eps)
            shift = beta - running_mean * scale
            w = w * scale[None, :]            # fold BN into the weight columns
            b = b * scale + shift             # fold BN into the bias
        else:
            # Lane-pad the final layer to 128 output columns (zeros) so the
            # kernel's final store is lane-dense; wrapper slices [:, :f_out].
            fout_pad = _round_up(max(fout, 128), 128)
            w = jnp.pad(w, ((0, 0), (0, fout_pad - fout)))
            b = jnp.pad(b, ((0, fout_pad - fout),))
            fout = fout_pad

        weights.append(w.astype(jnp.bfloat16))                 # bf16 on the MXU
        biases.append(b.reshape(1, fout).astype(jnp.float32))  # f32 epilogue
    return weights, biases


if __name__ == "__main__":
    key = jax.random.PRNGKey(0)
    k_in, k_param = jax.random.split(key)

    batch = 8
    features_in = 32
    x = jax.random.normal(k_in, (batch, features_in), jnp.float32)

    weights, biases = init_params(k_param, features_in)

    out = alzeimer_forward(x, weights, biases, features_out=1)
    out = jax.block_until_ready(out)

    assert out.shape == (batch, 1), out.shape
    assert bool(jnp.all(jnp.isfinite(out)))
    # Exact sigmoid -> strictly inside (0, 1).
    assert bool(jnp.all((out > 0.0) & (out < 1.0)))
    print("KERNEL_OK")
</pallas_src>

<mosaic_0001>
module attributes {stable_mosaic.version = 11 : i64} {
  func.func @_alzeimer_fused_kernel(%arg0: i32, %arg1: memref<8x32xf32, #tpu.memory_space<vmem>>, %arg2: memref<32x256xbf16, #tpu.memory_space<vmem>>, %arg3: memref<1x256xf32, #tpu.memory_space<vmem>>, %arg4: memref<256x256xbf16, #tpu.memory_space<vmem>>, %arg5: memref<1x256xf32, #tpu.memory_space<vmem>>, %arg6: memref<256x128xbf16, #tpu.memory_space<vmem>>, %arg7: memref<1x128xf32, #tpu.memory_space<vmem>>, %arg8: memref<128x64xbf16, #tpu.memory_space<vmem>>, %arg9: memref<1x64xf32, #tpu.memory_space<vmem>>, %arg10: memref<64x32xbf16, #tpu.memory_space<vmem>>, %arg11: memref<1x32xf32, #tpu.memory_space<vmem>>, %arg12: memref<32x128xbf16, #tpu.memory_space<vmem>>, %arg13: memref<1x128xf32, #tpu.memory_space<vmem>>, %arg14: memref<8x128xf32, #tpu.memory_space<vmem>>) attributes {dimension_semantics = [#tpu.dimension_semantics<parallel>], iteration_bounds = array<i64: 1>, scalar_prefetch = 0 : i64, scratch_operands = 0 : i64, tpu.core_type = #tpu.core_type<tc>, window_params = [{transform_indices = @transform_0, window_bounds = array<i64: 8, 32>}, {pipeline_mode = #tpu.pipeline_mode<synchronous>, transform_indices = @transform_1, window_bounds = array<i64: 32, 256>}, {pipeline_mode = #tpu.pipeline_mode<synchronous>, transform_indices = @transform_2, window_bounds = array<i64: 1, 256>}, {pipeline_mode = #tpu.pipeline_mode<synchronous>, transform_indices = @transform_3, window_bounds = array<i64: 256, 256>}, {pipeline_mode = #tpu.pipeline_mode<synchronous>, transform_indices = @transform_4, window_bounds = array<i64: 1, 256>}, {pipeline_mode = #tpu.pipeline_mode<synchronous>, transform_indices = @transform_5, window_bounds = array<i64: 256, 128>}, {pipeline_mode = #tpu.pipeline_mode<synchronous>, transform_indices = @transform_6, window_bounds = array<i64: 1, 128>}, {pipeline_mode = #tpu.pipeline_mode<synchronous>, transform_indices = @transform_7, window_bounds = array<i64: 128, 64>}, {pipeline_mode = #tpu.pipeline_mode<synchronous>, transform_indices = @transform_8, window_bounds = array<i64: 1, 64>}, {pipeline_mode = #tpu.pipeline_mode<synchronous>, transform_indices = @transform_9, window_bounds = array<i64: 64, 32>}, {pipeline_mode = #tpu.pipeline_mode<synchronous>, transform_indices = @transform_10, window_bounds = array<i64: 1, 32>}, {pipeline_mode = #tpu.pipeline_mode<synchronous>, transform_indices = @transform_11, window_bounds = array<i64: 32, 128>}, {pipeline_mode = #tpu.pipeline_mode<synchronous>, transform_indices = @transform_12, window_bounds = array<i64: 1, 128>}, {transform_indices = @transform_13, window_bounds = array<i64: 8, 128>}]} {
    %c0 = arith.constant 0 : index
    %c0_0 = arith.constant 0 : index
    %0 = vector.load %arg1[%c0, %c0_0] : memref<8x32xf32, #tpu.memory_space<vmem>>, vector<8x32xf32>
    %1 = arith.truncf %0 : vector<8x32xf32> to vector<8x32xbf16>
    %c0_1 = arith.constant 0 : index
    %c0_2 = arith.constant 0 : index
    %2 = vector.load %arg2[%c0_1, %c0_2] : memref<32x256xbf16, #tpu.memory_space<vmem>>, vector<32x256xbf16>
    %cst = arith.constant dense<0.000000e+00> : vector<8x256xf32>
    %3 = tpu.matmul %1, %2, %cst {dimension_numbers = #tpu.dot_dimension_numbers<[1], [0], [0], [1], [0, 0, 1, 1], [], []>} : vector<8x32xbf16>, vector<32x256xbf16>, vector<8x256xf32> -> vector<8x256xf32>
    %c0_3 = arith.constant 0 : index
    %c0_4 = arith.constant 0 : index
    %4 = vector.load %arg3[%c0_3, %c0_4] : memref<1x256xf32, #tpu.memory_space<vmem>>, vector<1x256xf32>
    %5 = vector.broadcast %4 : vector<1x256xf32> to vector<8x256xf32>
    %6 = arith.addf %3, %5 : vector<8x256xf32>
    %cst_5 = arith.constant 1.000000e-01 : f32
    %7 = vector.broadcast %cst_5 : f32 to vector<8x256xf32>
    %8 = arith.mulf %7, %6 : vector<8x256xf32>
    %9 = arith.maximumf %6, %8 : vector<8x256xf32>
    %10 = arith.truncf %9 : vector<8x256xf32> to vector<8x256xbf16>
    %c0_6 = arith.constant 0 : index
    %c0_7 = arith.constant 0 : index
    %11 = vector.load %arg4[%c0_6, %c0_7] : memref<256x256xbf16, #tpu.memory_space<vmem>>, vector<256x256xbf16>
    %cst_8 = arith.constant dense<0.000000e+00> : vector<8x256xf32>
    %12 = tpu.matmul %10, %11, %cst_8 {dimension_numbers = #tpu.dot_dimension_numbers<[1], [0], [0], [1], [0, 0, 1, 1], [], []>} : vector<8x256xbf16>, vector<256x256xbf16>, vector<8x256xf32> -> vector<8x256xf32>
    %c0_9 = arith.constant 0 : index
    %c0_10 = arith.constant 0 : index
    %13 = vector.load %arg5[%c0_9, %c0_10] : memref<1x256xf32, #tpu.memory_space<vmem>>, vector<1x256xf32>
    %14 = vector.broadcast %13 : vector<1x256xf32> to vector<8x256xf32>
    %15 = arith.addf %12, %14 : vector<8x256xf32>
    %cst_11 = arith.constant 1.000000e-01 : f32
    %16 = vector.broadcast %cst_11 : f32 to vector<8x256xf32>
    %17 = arith.mulf %16, %15 : vector<8x256xf32>
    %18 = arith.maximumf %15, %17 : vector<8x256xf32>
    %19 = arith.truncf %18 : vector<8x256xf32> to vector<8x256xbf16>
    %c0_12 = arith.constant 0 : index
    %c0_13 = arith.constant 0 : index
    %20 = vector.load %arg6[%c0_12, %c0_13] : memref<256x128xbf16, #tpu.memory_space<vmem>>, vector<256x128xbf16>
    %cst_14 = arith.constant dense<0.000000e+00> : vector<8x128xf32>
    %21 = tpu.matmul %19, %20, %cst_14 {dimension_numbers = #tpu.dot_dimension_numbers<[1], [0], [0], [1], [0, 0, 1, 1], [], []>} : vector<8x256xbf16>, vector<256x128xbf16>, vector<8x128xf32> -> vector<8x128xf32>
    %c0_15 = arith.constant 0 : index
    %c0_16 = arith.constant 0 : index
    %22 = vector.load %arg7[%c0_15, %c0_16] : memref<1x128xf32, #tpu.memory_space<vmem>>, vector<1x128xf32>
    %23 = vector.broadcast %22 : vector<1x128xf32> to vector<8x128xf32>
    %24 = arith.addf %21, %23 : vector<8x128xf32>
    %cst_17 = arith.constant 1.000000e-01 : f32
    %25 = vector.broadcast %cst_17 : f32 to vector<8x128xf32>
    %26 = arith.mulf %25, %24 : vector<8x128xf32>
    %27 = arith.maximumf %24, %26 : vector<8x128xf32>
    %28 = arith.truncf %27 : vector<8x128xf32> to vector<8x128xbf16>
    %c0_18 = arith.constant 0 : index
    %c0_19 = arith.constant 0 : index
    %29 = vector.load %arg8[%c0_18, %c0_19] : memref<128x64xbf16, #tpu.memory_space<vmem>>, vector<128x64xbf16>
    %cst_20 = arith.constant dense<0.000000e+00> : vector<8x64xf32>
    %30 = tpu.matmul %28, %29, %cst_20 {dimension_numbers = #tpu.dot_dimension_numbers<[1], [0], [0], [1], [0, 0, 1, 1], [], []>} : vector<8x128xbf16>, vector<128x64xbf16>, vector<8x64xf32> -> vector<8x64xf32>
    %c0_21 = arith.constant 0 : index
    %c0_22 = arith.constant 0 : index
    %31 = vector.load %arg9[%c0_21, %c0_22] : memref<1x64xf32, #tpu.memory_space<vmem>>, vector<1x64xf32>
    %32 = vector.broadcast %31 : vector<1x64xf32> to vector<8x64xf32>
    %33 = arith.addf %30, %32 : vector<8x64xf32>
    %cst_23 = arith.constant 1.000000e-01 : f32
    %34 = vector.broadcast %cst_23 : f32 to vector<8x64xf32>
    %35 = arith.mulf %34, %33 : vector<8x64xf32>
    %36 = arith.maximumf %33, %35 : vector<8x64xf32>
    %37 = arith.truncf %36 : vector<8x64xf32> to vector<8x64xbf16>
    %c0_24 = arith.constant 0 : index
    %c0_25 = arith.constant 0 : index
    %38 = vector.load %arg10[%c0_24, %c0_25] : memref<64x32xbf16, #tpu.memory_space<vmem>>, vector<64x32xbf16>
    %cst_26 = arith.constant dense<0.000000e+00> : vector<8x32xf32>
    %39 = tpu.matmul %37, %38, %cst_26 {dimension_numbers = #tpu.dot_dimension_numbers<[1], [0], [0], [1], [0, 0, 1, 1], [], []>} : vector<8x64xbf16>, vector<64x32xbf16>, vector<8x32xf32> -> vector<8x32xf32>
    %c0_27 = arith.constant 0 : index
    %c0_28 = arith.constant 0 : index
    %40 = vector.load %arg11[%c0_27, %c0_28] : memref<1x32xf32, #tpu.memory_space<vmem>>, vector<1x32xf32>
    %41 = vector.broadcast %40 : vector<1x32xf32> to vector<8x32xf32>
    %42 = arith.addf %39, %41 : vector<8x32xf32>
    %cst_29 = arith.constant 1.000000e-01 : f32
    %43 = vector.broadcast %cst_29 : f32 to vector<8x32xf32>
    %44 = arith.mulf %43, %42 : vector<8x32xf32>
    %45 = arith.maximumf %42, %44 : vector<8x32xf32>
    %46 = arith.truncf %45 : vector<8x32xf32> to vector<8x32xbf16>
    %c0_30 = arith.constant 0 : index
    %c0_31 = arith.constant 0 : index
    %47 = vector.load %arg12[%c0_30, %c0_31] : memref<32x128xbf16, #tpu.memory_space<vmem>>, vector<32x128xbf16>
    %cst_32 = arith.constant dense<0.000000e+00> : vector<8x128xf32>
    %48 = tpu.matmul %46, %47, %cst_32 {dimension_numbers = #tpu.dot_dimension_numbers<[1], [0], [0], [1], [0, 0, 1, 1], [], []>} : vector<8x32xbf16>, vector<32x128xbf16>, vector<8x128xf32> -> vector<8x128xf32>
    %c0_33 = arith.constant 0 : index
    %c0_34 = arith.constant 0 : index
    %49 = vector.load %arg13[%c0_33, %c0_34] : memref<1x128xf32, #tpu.memory_space<vmem>>, vector<1x128xf32>
    %50 = vector.broadcast %49 : vector<1x128xf32> to vector<8x128xf32>
    %51 = arith.addf %48, %50 : vector<8x128xf32>
    %cst_35 = arith.constant 0.000000e+00 : f32
    %52 = vector.broadcast %cst_35 : f32 to vector<8x128xf32>
    %53 = arith.subf %52, %51 : vector<8x128xf32>
    %54 = math.exp %53 : vector<8x128xf32>
    %cst_36 = arith.constant 1.000000e+00 : f32
    %55 = vector.broadcast %cst_36 : f32 to vector<8x128xf32>
    %56 = arith.addf %55, %54 : vector<8x128xf32>
    %cst_37 = arith.constant 1.000000e+00 : f32
    %57 = vector.broadcast %cst_37 : f32 to vector<8x128xf32>
    %58 = arith.divf %57, %56 : vector<8x128xf32>
    %c0_38 = arith.constant 0 : index
    %c0_39 = arith.constant 0 : index
    %59 = vector.load %arg14[%c0_38, %c0_39] : memref<8x128xf32, #tpu.memory_space<vmem>>, vector<8x128xf32>
    tpu.vector_store %arg14[%c0_38, %c0_39], %58 {strides = array<i32>} : memref<8x128xf32, #tpu.memory_space<vmem>>, vector<8x128xf32>,
    return
  }
  func.func @transform_0(%arg0: i32) -> (i32, i32) {
    %c0_i32 = arith.constant 0 : i32
    %c0_i32_0 = arith.constant 0 : i32
    return %arg0, %c0_i32 : i32, i32
  }
  func.func @transform_1(%arg0: i32) -> (i32, i32) {
    %c0_i32 = arith.constant 0 : i32
    %c0_i32_0 = arith.constant 0 : i32
    %c0_i32_1 = arith.constant 0 : i32
    return %c0_i32, %c0_i32_0 : i32, i32
  }
  func.func @transform_2(%arg0: i32) -> (i32, i32) {
    %c0_i32 = arith.constant 0 : i32
    %c0_i32_0 = arith.constant 0 : i32
    %c0_i32_1 = arith.constant 0 : i32
    return %c0_i32, %c0_i32_0 : i32, i32
  }
  func.func @transform_3(%arg0: i32) -> (i32, i32) {
    %c0_i32 = arith.constant 0 : i32
    %c0_i32_0 = arith.constant 0 : i32
    %c0_i32_1 = arith.constant 0 : i32
    return %c0_i32, %c0_i32_0 : i32, i32
  }
  func.func @transform_4(%arg0: i32) -> (i32, i32) {
    %c0_i32 = arith.constant 0 : i32
    %c0_i32_0 = arith.constant 0 : i32
    %c0_i32_1 = arith.constant 0 : i32
    return %c0_i32, %c0_i32_0 : i32, i32
  }
  func.func @transform_5(%arg0: i32) -> (i32, i32) {
    %c0_i32 = arith.constant 0 : i32
    %c0_i32_0 = arith.constant 0 : i32
    %c0_i32_1 = arith.constant 0 : i32
    return %c0_i32, %c0_i32_0 : i32, i32
  }
  func.func @transform_6(%arg0: i32) -> (i32, i32) {
    %c0_i32 = arith.constant 0 : i32
    %c0_i32_0 = arith.constant 0 : i32
    %c0_i32_1 = arith.constant 0 : i32
    return %c0_i32, %c0_i32_0 : i32, i32
  }
  func.func @transform_7(%arg0: i32) -> (i32, i32) {
    %c0_i32 = arith.constant 0 : i32
    %c0_i32_0 = arith.constant 0 : i32
    %c0_i32_1 = arith.constant 0 : i32
    return %c0_i32, %c0_i32_0 : i32, i32
  }
  func.func @transform_8(%arg0: i32) -> (i32, i32) {
    %c0_i32 = arith.constant 0 : i32
    %c0_i32_0 = arith.constant 0 : i32
    %c0_i32_1 = arith.constant 0 : i32
    return %c0_i32, %c0_i32_0 : i32, i32
  }
  func.func @transform_9(%arg0: i32) -> (i32, i32) {
    %c0_i32 = arith.constant 0 : i32
    %c0_i32_0 = arith.constant 0 : i32
    %c0_i32_1 = arith.constant 0 : i32
    return %c0_i32, %c0_i32_0 : i32, i32
  }
  func.func @transform_10(%arg0: i32) -> (i32, i32) {
    %c0_i32 = arith.constant 0 : i32
    %c0_i32_0 = arith.constant 0 : i32
    %c0_i32_1 = arith.constant 0 : i32
    return %c0_i32, %c0_i32_0 : i32, i32
  }
  func.func @transform_11(%arg0: i32) -> (i32, i32) {
    %c0_i32 = arith.constant 0 : i32
    %c0_i32_0 = arith.constant 0 : i32
    %c0_i32_1 = arith.constant 0 : i32
    return %c0_i32, %c0_i32_0 : i32, i32
  }
  func.func @transform_12(%arg0: i32) -> (i32, i32) {
    %c0_i32 = arith.constant 0 : i32
    %c0_i32_0 = arith.constant 0 : i32
    %c0_i32_1 = arith.constant 0 : i32
    return %c0_i32, %c0_i32_0 : i32, i32
  }
  func.func @transform_13(%arg0: i32) -> (i32, i32) {
    %c0_i32 = arith.constant 0 : i32
    %c0_i32_0 = arith.constant 0 : i32
    return %arg0, %c0_i32 : i32, i32
  }
}

</mosaic_0001>

<bundles_post_ra>
// kernel: alzeimer_forward.1
= control target key start
LH: loop header
LB: loop body
LE: loop exit
PB: predicated region body
PF: predicated region fallthrough
CT: control target
= control target key end

     0   :  { %18 = vsyncpa [#allocation3], 0  ;;  %s1398_s0 = inlined_call_operand.hbm [shape: f32[8,32], index: 0, kind: input, shape index: {}]   ;;  %s1399_s1 = inlined_call_operand.hbm [shape: bf16[32,256], index: 1, kind: input, shape index: {}]   ;;  %s1400_s2 = inlined_call_operand.vmem [shape: f32[1,256], index: 2, kind: input, shape index: {}]   ;;  %s1401_s3 = inlined_call_operand.hbm [shape: bf16[256,256], index: 3, kind: input, shape index: {}]   ;;  %s1402_s4 = inlined_call_operand.vmem [shape: f32[1,256], index: 4, kind: input, shape index: {}]   ;;  %s1403_s5 = inlined_call_operand.vmem [shape: bf16[256,128], index: 5, kind: input, shape index: {}]   ;;  %s1404_s6 = inlined_call_operand.vmem [shape: f32[1,128], index: 6, kind: input, shape index: {}]   ;;  %s1405_s7 = inlined_call_operand.vmem [shape: bf16[128,64], index: 7, kind: input, shape index: {}]   ;;  %s1406_s8 = inlined_call_operand.vmem [shape: f32[1,64], index: 8, kind: input, shape index: {}]   ;;  %s1407_s9 = inlined_call_operand.vmem [shape: bf16[64,32], index: 9, kind: input, shape index: {}]   ;;  %s1408_s10 = inlined_call_operand.vmem [shape: f32[1,32], index: 10, kind: input, shape index: {}]   ;;  %s1409_s11 = inlined_call_operand.vmem [shape: bf16[32,128], index: 11, kind: input, shape index: {}]   ;;  %s1410_s12 = inlined_call_operand.vmem [shape: f32[1,128], index: 12, kind: input, shape index: {}]   ;;  %s1411_s13 = inlined_call_operand.vmem [shape: f32[8,128], index: 13, kind: output, shape index: {}]  }
   0x1   :  { %19 = vsyncpa [#allocation5], 0  ;;  %s35_s27 = sshll.u32 %s1399_s1, 4  ;;  %s1200_s28 = smov [#allocation4]   ;;  %s36_s27 = int_to_ptr.hbm [resolvable:$true] %s35_s27 }
   0x2   :  { %s37_s29 = sshll.u32 %s1200_s28, 4  ;;  %s25_s15 = sshll.u32 %s1398_s0, 4  ;;  %s38_s29 = int_to_ptr.vmem [resolvable:$true] %s37_s29  ;;  %s26_s15 = int_to_ptr.hbm [resolvable:$true] %s25_s15 }
   0x3   :  { %s1201_s16 = smov 128   ;;  %s1202_s17 = smov 8  }
   0x4   :  { %43 = dma.hbm_to_vmem [thread:$0]  %s36_s27, 512, %s38_s29, [#allocation5], %s1201_s16, %s1201_s16, %s1202_s17  }
   0x5   :  { %s1203_s18 = smov [#allocation2]   ;;  %s50_s22 = sshll.u32 %s1401_s3, 4  ;;  %s51_s22 = int_to_ptr.hbm [resolvable:$true] %s50_s22 }
   0x6   :  { %s27_s19 = sshll.u32 %s1203_s18, 4  ;;  %s1204_s1 = smov [#allocation6]   ;;  %s28_s19 = int_to_ptr.vmem [resolvable:$true] %s27_s19 }
   0x7   :  { %30 = dma.hbm_to_vmem [thread:$0]  %s26_s15, 128, %s28_s19, [#allocation3]  }
   0x8   :  { %s52_s23 = sshll.u32 %s1204_s1, 4  ;;  %s53_s23 = int_to_ptr.vmem [resolvable:$true] %s52_s23 }
   0x9   :  { %58 = dma.hbm_to_vmem [thread:$0]  %s51_s22, 4096, %s53_s23, [#allocation5], %s1201_s16, %s1201_s16, %s1202_s17  }
   0xa   :  { %1196 = dma.done.wait [#allocation3], 128  }
   0xb   :  { %1197 = vsyncadd [#allocation3], 4294967168 }
   0xc   :  { %1198 = dma.done.wait [#allocation5], 4608  }
   0xd   :  { %1199 = vsyncadd [#allocation5], 4294962688  ;;  %v787_v0 = vld [vmem:[#allocation4 + $0x10] sm:$0xf]  ;;  %v1048_v1 = vld [vmem:[#allocation4 + $0x14] sm:$0xf0] }
   0xe   :  { %v1047_v2 = vld [vmem:[#allocation4 + $0x14] sm:$0xf]  ;;  %v788_v3 = vor.u32 %v1048_v1, %v787_v0  ;;  %v789_v4 = vld [vmem:[#allocation4 + $0x18] sm:$0xf0]  ;;  %v779_v5 = vld [vmem:[#allocation4] sm:$0xf] }
   0xf   :  { %v1046_v6 = vld [vmem:[#allocation4 + $0x4] sm:$0xf0]  ;;  %v792_v7 = vor.u32 %v1047_v2, %v789_v4  ;;  %v1045_v8 = vld [vmem:[#allocation4 + $0x4] sm:$0xf]  ;;  %v781_v9 = vld [vmem:[#allocation4 + $0x8] sm:$0xf0] }
  0x10   :  { %v90_v10 = vld [vmem:[#allocation2] sm:$0xff]  ;;  %vm122_vm0 = vcmask 261120   ;;  %132 = vmatpush.bf16.msra.mxu0 %v788_v3  ;;  %v780_v11 = vor.u32 %v1046_v6, %v779_v5  ;;  %v853_v12 = vld [vmem:[#allocation6 + $0x70] sm:$0xf]  ;;  %v784_v15 = vor.u32 %v1045_v8, %v781_v9  ;;  %v1063_v18 = vld [vmem:[#allocation6 + $0x74] sm:$0xf] }
  0x11   :  { %v1064_v13 = vld [vmem:[#allocation6 + $0x74] sm:$0xf0]  ;;  %v917_v14 = vld [vmem:[#allocation6 + $0xf0] sm:$0xf]  ;;  %145 = vmatpush.bf16.msra.mxu1 %v792_v7  ;;  %v855_v19 = vld [vmem:[#allocation6 + $0x78] sm:$0xf0]  ;;  %v91_v25 = vpack.c.bf16 %v90_v10, %v90_v10 }
  0x12   :  { %v854_v16 = vor.u32 %v1064_v13, %v853_v12  ;;  %v1080_v17 = vld [vmem:[#allocation6 + $0xf4] sm:$0xf0]  ;;  %v858_v21 = vor.u32 %v1063_v18, %v855_v19  ;;  %v1079_v22 = vld [vmem:[#allocation6 + $0xf4] sm:$0xf]  ;;  %v919_v23 = vld [vmem:[#allocation6 + $0xf8] sm:$0xf0] }
  0x13   :  { %v918_v20 = vor.u32 %v1080_v17, %v917_v14  ;;  %v845_v24 = vld [vmem:[#allocation6 + $0x60] sm:$0xf]  ;;  %v922_v26 = vor.u32 %v1079_v22, %v919_v23  ;;  %v1062_v27 = vld [vmem:[#allocation6 + $0x64] sm:$0xf0]  ;;  %v1061_v32 = vld [vmem:[#allocation6 + $0x64] sm:$0xf] }
  0x14   :  { %356 = vmatpush.bf16.msra.mxu2 %v854_v16  ;;  %v909_v28 = vld [vmem:[#allocation6 + $0xe0] sm:$0xf]  ;;  %v1078_v29 = vld [vmem:[#allocation6 + $0xe4] sm:$0xf0]  ;;  %133 = vmatpush.bf16.msra.mxu0 %v780_v11  ;;  %v846_v30 = vor.u32 %v1062_v27, %v845_v24  ;;  %v847_v33 = vld [vmem:[#allocation6 + $0x68] sm:$0xf0] }
  0x15   :  { %369 = vmatpush.bf16.msra.mxu3 %v918_v20  ;;  %v910_v31 = vor.u32 %v1078_v29, %v909_v28  ;;  %v1077_v34 = vld [vmem:[#allocation6 + $0xe4] sm:$0xf]  ;;  %146 = vmatpush.bf16.msra.mxu1 %v784_v15  ;;  %v850_v35 = vor.u32 %v1061_v32, %v847_v33  ;;  %v911_v36 = vld [vmem:[#allocation6 + $0xe8] sm:$0xf0]  ;;  %v837_v37 = vld [vmem:[#allocation6 + $0x50] sm:$0xf] }
  0x16   :  { %v1060_v38 = vld [vmem:[#allocation6 + $0x54] sm:$0xf0]  ;;  %v914_v39 = vor.u32 %v1077_v34, %v911_v36  ;;  %v901_v40 = vld [vmem:[#allocation6 + $0xd0] sm:$0xf]  ;;  %v1059_v42 = vld [vmem:[#allocation6 + $0x54] sm:$0xf] }
  0x17   :  { %v1076_v41 = vld [vmem:[#allocation6 + $0xd4] sm:$0xf0]  ;;  %793 = vmatmul.msk.bf16.vlgmr.msra.gmra.mxu0 %vm122_vm0, %v91_v25  ;;  %v838_v43 = vor.u32 %v1060_v38, %v837_v37  ;;  %v839_v44 = vld [vmem:[#allocation6 + $0x58] sm:$0xf0]  ;;  %v1075_v45 = vld [vmem:[#allocation6 + $0xd4] sm:$0xf] }
  0x18   :  { %382 = vmatpush.bf16.msrb.mxu0 %v858_v21  ;;  %357 = vmatpush.bf16.msra.mxu2 %v846_v30  ;;  %v903_v46 = vld [vmem:[#allocation6 + $0xd8] sm:$0xf0]  ;;  %v902_v47 = vor.u32 %v1076_v41, %v901_v40  ;;  %v829_v48 = vld [vmem:[#allocation6 + $0x40] sm:$0xf]  ;;  %v1058_v49 = vld [vmem:[#allocation6 + $0x44] sm:$0xf0]  ;;  %v842_v50 = vor.u32 %v1059_v42, %v839_v44 }
  0x19   :  { %395 = vmatpush.bf16.msrb.mxu1 %v922_v26  ;;  %370 = vmatpush.bf16.msra.mxu3 %v910_v31  ;;  %v893_v51 = vld [vmem:[#allocation6 + $0xc0] sm:$0xf]  ;;  %v1074_v52 = vld [vmem:[#allocation6 + $0xc4] sm:$0xf0]  ;;  %v906_v53 = vor.u32 %v1075_v45, %v903_v46  ;;  %v1057_v54 = vld [vmem:[#allocation6 + $0x44] sm:$0xf]  ;;  %v830_v56 = vor.u32 %v1058_v49, %v829_v48 }
  0x1a   :  { %794 = vmatmul.msk.bf16.vlgmr.msra.gmra.mxu1 %vm122_vm0, %v91_v25  ;;  %v831_v55 = vld [vmem:[#allocation6 + $0x48] sm:$0xf0]  ;;  %v1073_v57 = vld [vmem:[#allocation6 + $0xc4] sm:$0xf]  ;;  %v894_v59 = vor.u32 %v1074_v52, %v893_v51  ;;  %v821_v60 = vld [vmem:[#allocation6 + $0x30] sm:$0xf] }
  0x1b   :  { %v895_v58 = vld [vmem:[#allocation6 + $0xc8] sm:$0xf0]  ;;  %v1056_v61 = vld [vmem:[#allocation6 + $0x34] sm:$0xf0]  ;;  %v834_v62 = vor.u32 %v1057_v54, %v831_v55  ;;  %v885_v63 = vld [vmem:[#allocation6 + $0xb0] sm:$0xf] }
  0x1c   :  { %383 = vmatpush.bf16.msrb.mxu0 %v850_v35  ;;  %358 = vmatpush.bf16.msra.mxu2 %v838_v43  ;;  %v1072_v0 = vld [vmem:[#allocation6 + $0xb4] sm:$0xf0]  ;;  %v898_v1 = vor.u32 %v1073_v57, %v895_v58  ;;  %v1055_v2 = vld [vmem:[#allocation6 + $0x34] sm:$0xf]  ;;  %v823_v3 = vld [vmem:[#allocation6 + $0x38] sm:$0xf0]  ;;  %v822_v5 = vor.u32 %v1056_v61, %v821_v60 }
  0x1d   :  { %396 = vmatpush.bf16.msrb.mxu1 %v914_v39  ;;  %371 = vmatpush.bf16.msra.mxu3 %v902_v47  ;;  %v1071_v4 = vld [vmem:[#allocation6 + $0xb4] sm:$0xf]  ;;  %v887_v6 = vld [vmem:[#allocation6 + $0xb8] sm:$0xf0]  ;;  %v813_v7 = vld [vmem:[#allocation6 + $0x20] sm:$0xf]  ;;  %v886_v9 = vor.u32 %v1072_v0, %v885_v63  ;;  %v826_v11 = vor.u32 %v1055_v2, %v823_v3 }
  0x1e   :  { %v1054_v8 = vld [vmem:[#allocation6 + $0x24] sm:$0xf0]  ;;  %v877_v10 = vld [vmem:[#allocation6 + $0xa0] sm:$0xf]  ;;  %v890_v13 = vor.u32 %v1071_v4, %v887_v6  ;;  %v1053_v14 = vld [vmem:[#allocation6 + $0x24] sm:$0xf] }
  0x1f   :  { %v1070_v12 = vld [vmem:[#allocation6 + $0xa4] sm:$0xf0]  ;;  %v815_v15 = vld [vmem:[#allocation6 + $0x28] sm:$0xf0]  ;;  %v814_v16 = vor.u32 %v1054_v8, %v813_v7  ;;  %v1069_v17 = vld [vmem:[#allocation6 + $0xa4] sm:$0xf] }
  0x20   :  { %384 = vmatpush.bf16.msrb.mxu0 %v842_v50  ;;  %359 = vmatpush.bf16.msra.mxu2 %v830_v56  ;;  %v879_v18 = vld [vmem:[#allocation6 + $0xa8] sm:$0xf0]  ;;  %v878_v19 = vor.u32 %v1070_v12, %v877_v10  ;;  %v818_v20 = vor.u32 %v1053_v14, %v815_v15  ;;  %v805_v22 = vld [vmem:[#allocation6 + $0x10] sm:$0xf]  ;;  %v1052_v23 = vld [vmem:[#allocation6 + $0x14] sm:$0xf0] }
  0x21   :  { %397 = vmatpush.bf16.msrb.mxu1 %v906_v53  ;;  %372 = vmatpush.bf16.msra.mxu3 %v894_v59  ;;  %v882_v21 = vor.u32 %v1069_v17, %v879_v18  ;;  %v806_v24 = vor.u32 %v1052_v23, %v805_v22  ;;  %v869_v25 = vld [vmem:[#allocation6 + $0x90] sm:$0xf]  ;;  %v1068_v26 = vld [vmem:[#allocation6 + $0x94] sm:$0xf0]  ;;  %v1051_v27 = vld [vmem:[#allocation6 + $0x14] sm:$0xf] }
  0x22   :  { %v870_v28 = vor.u32 %v1068_v26, %v869_v25  ;;  %v807_v29 = vld [vmem:[#allocation6 + $0x18] sm:$0xf0]  ;;  %v1067_v30 = vld [vmem:[#allocation6 + $0x94] sm:$0xf]  ;;  %v797_v34 = vld [vmem:[#allocation6] sm:$0xf] }
  0x23   :  { %v871_v31 = vld [vmem:[#allocation6 + $0x98] sm:$0xf0]  ;;  %v810_v32 = vor.u32 %v1051_v27, %v807_v29  ;;  %v1050_v35 = vld [vmem:[#allocation6 + $0x4] sm:$0xf0]  ;;  %v861_v36 = vld [vmem:[#allocation6 + $0x80] sm:$0xf] }
  0x24   :  { %385 = vmatpush.bf16.msrb.mxu0 %v834_v62  ;;  %360 = vmatpush.bf16.msra.mxu2 %v822_v5  ;;  %v874_v33 = vor.u32 %v1067_v30, %v871_v31  ;;  %v798_v37 = vor.u32 %v1050_v35, %v797_v34  ;;  %v1066_v38 = vld [vmem:[#allocation6 + $0x84] sm:$0xf0]  ;;  %v1049_v39 = vld [vmem:[#allocation6 + $0x4] sm:$0xf]  ;;  %v799_v40 = vld [vmem:[#allocation6 + $0x8] sm:$0xf0] }
  0x25   :  { %398 = vmatpush.bf16.msrb.mxu1 %v898_v1  ;;  %373 = vmatpush.bf16.msra.mxu3 %v886_v9  ;;  %v862_v41 = vor.u32 %v1066_v38, %v861_v36  ;;  %v802_v42 = vor.u32 %v1049_v39, %v799_v40  ;;  %v1065_v43 = vld [vmem:[#allocation6 + $0x84] sm:$0xf]  ;;  %v863_v44 = vld [vmem:[#allocation6 + $0x88] sm:$0xf0]  ;;  %v1096_v46 = vld [vmem:[%s1403_s5 + $0x78] sm:$0xff]  ;;  %vm695_vm1 = vcmask 523264  }
  0x26   :  { %v866_v45 = vor.u32 %v1065_v43, %v863_v44  ;;  %v1088_v47 = vld [vmem:[%s1403_s5 + $0x38] sm:$0xff]  ;;  %v1095_v48 = vld [vmem:[%s1403_s5 + $0x70] sm:$0xff]  ;;  %v1094_v50 = vld [vmem:[%s1403_s5 + $0x68] sm:$0xff] }
  0x27   :  { %v1087_v49 = vld [vmem:[%s1403_s5 + $0x30] sm:$0xff]  ;;  %v1086_v51 = vld [vmem:[%s1403_s5 + $0x28] sm:$0xff]  ;;  %v1093_v52 = vld [vmem:[%s1403_s5 + $0x60] sm:$0xff] }
  0x28   :  { %386 = vmatpush.bf16.msrb.mxu0 %v826_v11  ;;  %361 = vmatpush.bf16.msra.mxu2 %v814_v16  ;;  %v1085_v53 = vld [vmem:[%s1403_s5 + $0x20] sm:$0xff]  ;;  %v1092_v54 = vld [vmem:[%s1403_s5 + $0x58] sm:$0xff]  ;;  %v1091_v6 = vld [vmem:[%s1403_s5 + $0x50] sm:$0xff] }
  0x29   :  { %399 = vmatpush.bf16.msrb.mxu1 %v890_v13  ;;  %374 = vmatpush.bf16.msra.mxu3 %v878_v19  ;;  %v96_v55 = vld [vmem:[%s1400_s2] sm:$0x3]  ;;  %v1084_v7 = vld [vmem:[%s1403_s5 + $0x18] sm:$0xff]  ;;  %v1090_v8 = vld [vmem:[%s1403_s5 + $0x48] sm:$0xff] }
  0x2a   :  { %v98_v56 = vperm.slane %v96_v55, 0  ;;  %v99_v57 = vperm.slane %v96_v55, 1  ;;  %v1083_v9 = vld [vmem:[%s1403_s5 + $0x10] sm:$0xff]  ;;  %v1089_v10 = vld [vmem:[%s1403_s5 + $0x40] sm:$0xff]  ;;  %v1082_v11 = vld [vmem:[%s1403_s5 + $0x8] sm:$0xff] }
  0x2b   :  { %v1081_v12 = vld [vmem:[%s1403_s5] sm:$0xff]  ;;  %v1104_v13 = vld [vmem:[%s1405_s7 + $0x38] sm:$0xff]  ;;  %v1103_v14 = vld [vmem:[%s1405_s7 + $0x30] sm:$0xff] }
  0x2c   :  { %387 = vmatpush.bf16.msrb.mxu0 %v818_v20  ;;  %362 = vmatpush.bf16.msra.mxu2 %v806_v24  ;;  %v1102_v15 = vld [vmem:[%s1405_s7 + $0x28] sm:$0xff]  ;;  %v190_v16 = vld [vmem:[%s1402_s4] sm:$0x3]  ;;  %v1100_v38 = vld [vmem:[%s1405_s7 + $0x18] sm:$0xff] }
  0x2d   :  { %400 = vmatpush.bf16.msrb.mxu1 %v882_v21  ;;  %375 = vmatpush.bf16.msra.mxu3 %v870_v28  ;;  %v1101_v17 = vld [vmem:[%s1405_s7 + $0x20] sm:$0xff]  ;;  %v193_v18 = vperm.slane %v190_v16, 1  ;;  %v192_v23 = vperm.slane %v190_v16, 0  ;;  %v1099_v39 = vld [vmem:[%s1405_s7 + $0x10] sm:$0xff]  ;;  %v1098_v40 = vld [vmem:[%s1405_s7 + $0x8] sm:$0xff] }
  0x2e   :  { %v1107_v43 = vld [vmem:[%s1407_s9 + $0x10] sm:$0xff]  ;;  %v1105_v55 = vld [vmem:[%s1407_s9] sm:$0xff] }
  0x30   :  { %388 = vmatpush.bf16.msrb.mxu0 %v810_v32  ;;  %363 = vmatpush.bf16.msra.mxu2 %v798_v37 }
  0x31   :  { %401 = vmatpush.bf16.msrb.mxu1 %v874_v33  ;;  %376 = vmatpush.bf16.msra.mxu3 %v862_v41  ;;  %v1097_v41 = vld [vmem:[%s1405_s7] sm:$0xff] }
  0x34   :  { %389 = vmatpush.bf16.msrb.mxu0 %v802_v42  ;;  %546 = vmatpush.bf16.msrb.mxu2 %v1088_v47  ;;  %v1108_v42 = vld [vmem:[%s1407_s9 + $0x18] sm:$0xff] }
  0x35   :  { %402 = vmatpush.bf16.msrb.mxu1 %v866_v45  ;;  %559 = vmatpush.bf16.msrb.mxu3 %v1096_v46  ;;  %v1116_v45 = vld [vmem:[%s1404_s6] ss:$0 sm:$0xff] }
  0x38   :  { %547 = vmatpush.bf16.msrb.mxu2 %v1087_v49  ;;  %643 = vmatpush.bf16.msra.mxu0 %v1104_v13 }
  0x39   :  { %560 = vmatpush.bf16.msrb.mxu3 %v1095_v48  ;;  %703 = vmatpush.bf16.msra.mxu1 %v1108_v42 }
  0x3c   :  { %548 = vmatpush.bf16.msrb.mxu2 %v1086_v51  ;;  %644 = vmatpush.bf16.msra.mxu0 %v1103_v14 }
  0x3d   :  { %561 = vmatpush.bf16.msrb.mxu3 %v1094_v50  ;;  %704 = vmatpush.bf16.msra.mxu1 %v1107_v43 }
  0x40   :  { %549 = vmatpush.bf16.msrb.mxu2 %v1085_v53  ;;  %645 = vmatpush.bf16.msra.mxu0 %v1102_v15 }
  0x41   :  { %562 = vmatpush.bf16.msrb.mxu3 %v1093_v52 }
  0x44   :  { %550 = vmatpush.bf16.msrb.mxu2 %v1084_v7  ;;  %646 = vmatpush.bf16.msra.mxu0 %v1101_v17 }
  0x45   :  { %563 = vmatpush.bf16.msrb.mxu3 %v1092_v54  ;;  %v1106_v54 = vld [vmem:[%s1407_s9 + $0x8] sm:$0xff] }
  0x46   :  { %705 = vmatpush.bf16.msra.mxu1 %v1106_v54 }
  0x48   :  { %551 = vmatpush.bf16.msrb.mxu2 %v1083_v9  ;;  %647 = vmatpush.bf16.msra.mxu0 %v1100_v38 }
  0x49   :  { %564 = vmatpush.bf16.msrb.mxu3 %v1091_v6 }
  0x4a   :  { %706 = vmatpush.bf16.msra.mxu1 %v1105_v55 }
  0x4c   :  { %552 = vmatpush.bf16.msrb.mxu2 %v1082_v11  ;;  %648 = vmatpush.bf16.msra.mxu0 %v1099_v39 }
  0x4d   :  { %565 = vmatpush.bf16.msrb.mxu3 %v1090_v8  ;;  %v1119_v8 = vld [vmem:[%s1410_s12] ss:$0 sm:$0xff] }
  0x50   :  { %553 = vmatpush.bf16.msrb.mxu2 %v1081_v12  ;;  %649 = vmatpush.bf16.msra.mxu0 %v1098_v40 }
  0x51   :  { %566 = vmatpush.bf16.msrb.mxu3 %v1089_v10 }
  0x54   :  { %650 = vmatpush.bf16.msra.mxu0 %v1097_v41 }
  0x94   :  { %v135_v58 = vpop.f32.mrf.mxu0 }
  0x95   :  { %v136_v59 = vadd.f32 %v135_v58, %v98_v56  ;;  %v1110_v56 = vld [vmem:[%s1409_s11 + $0x8] sm:$0xff] }
  0x97   :  { %v148_v60 = vpop.f32.mrf.mxu1  ;;  %v152_v62 = vmul.f32 0.1, %v136_v59 }
  0x98   :  { %v149_v61 = vadd.f32 %v148_v60, %v99_v57  ;;  %v1117_v57 = vld [vmem:[%s1406_s8] ss:$0 sm:$0xff] }
  0x99   :  { %v154_v0 = vmax.f32 %v136_v59, %v152_v62 }
  0x9a   :  { %v153_v63 = vmul.f32 0.1, %v149_v61 }
  0x9b   :  { %v156_v2 = vpack.c.bf16 %v154_v0, %v154_v0  ;;  %v1109_v0 = vld [vmem:[%s1409_s11] sm:$0xff] }
  0x9c   :  { %v155_v1 = vmax.f32 %v149_v61, %v153_v63  ;;  %v137_v3 = vpop.f32.mrf.mxu0 }
  0x9d   :  { %364 = vmatmul.bf16.vlgmr.msra.gmra.mxu2 %v156_v2  ;;  %390 = vmatmul.bf16.vlgmr.msrb.gmra.mxu0 %v156_v2 }
  0x9e   :  { %v157_v4 = vpack.c.bf16 %v155_v1, %v155_v1  ;;  %v1118_v1 = vld [vmem:[%s1408_s10] ss:$0 sm:$0xff] }
  0x9f   :  { %v150_v5 = vpop.f32.mrf.mxu1 }
  0xa0   :  { %377 = vmatmul.bf16.vlgmr.msra.gmra.mxu3 %v157_v4  ;;  %403 = vmatmul.bf16.vlgmr.msrb.gmra.mxu1 %v157_v4 }
  0xa1   :  { %744 = vmatpush.bf16.msrb.mxu1 %v1110_v56 }
  0xa5   :  { %745 = vmatpush.bf16.msrb.mxu1 %v1109_v0 }
 0x11a   :  { %v391_v19 = vpop.f32.mrf.mxu0 }
 0x11b   :  { %v392_v20 = vadd.f32 %v391_v19, %v193_v18 }
 0x11d   :  { %v404_v21 = vpop.f32.mrf.mxu1 }
 0x11e   :  { %v405_v22 = vadd.f32 %v404_v21, %v392_v20 }
 0x120   :  { %v409_v24 = vmul.f32 0.1, %v405_v22  ;;  %v365_v25 = vpop.f32.mrf.mxu2 }
 0x121   :  { %v366_v27 = vadd.f32 %v365_v25, %v192_v23 }
 0x122   :  { %v411_v26 = vmax.f32 %v405_v22, %v409_v24  ;;  %v393_v29 = vpop.f32.mrf.mxu0 }
 0x123   :  { %v378_v28 = vpop.f32.mrf.mxu3 }
 0x124   :  { %v413_v30 = vpack.c.bf16 %v411_v26, %v411_v26  ;;  %v379_v31 = vadd.f32 %v378_v28, %v366_v27 }
 0x125   :  { %v406_v32 = vpop.f32.mrf.mxu1 }
 0x126   :  { %v408_v33 = vmul.f32 0.1, %v379_v31  ;;  %567 = vmatmul.bf16.vlgmr.msrb.gmra.mxu3 %v413_v30 }
 0x128   :  { %v410_v34 = vmax.f32 %v379_v31, %v408_v33  ;;  %v367_v35 = vpop.f32.mrf.mxu2 }
 0x12a   :  { %v412_v36 = vpack.c.bf16 %v410_v34, %v410_v34 }
 0x12b   :  { %v380_v37 = vpop.f32.mrf.mxu3 }
 0x12c   :  { %554 = vmatmul.bf16.vlgmr.msrb.gmra.mxu2 %v412_v36 }
 0x1a9   :  { %v568_v44 = vpop.f32.mrf.mxu3 }
 0x1af   :  { %v555_v46 = vpop.f32.mrf.mxu2 }
 0x1b0   :  { %v556_v47 = vadd.f32 %v1116_v45, %v555_v46 }
 0x1b1   :  { %v570_v48 = vpop.f32.mrf.mxu3 }
 0x1b2   :  { %v569_v49 = vadd.f32 %v568_v44, %v556_v47 }
 0x1b4   :  { %v572_v50 = vmul.f32 0.1, %v569_v49 }
 0x1b6   :  { %v573_v51 = vmax.f32 %v569_v49, %v572_v50 }
 0x1b7   :  { %v557_v52 = vpop.f32.mrf.mxu2 }
 0x1b8   :  { %v574_v53 = vpack.c.bf16 %v573_v51, %v573_v51 }
 0x1ba   :  { %651 = vmatmul.bf16.vlgmr.msra.gmra.mxu0 %v574_v53 }
 0x237   :  { %v652_v58 = vpop.f32.mrf.mxu0 }
 0x238   :  { %v653_v59 = vadd.f32 %v1117_v57, %v652_v58 }
 0x23a   :  { %v656_v60 = vmul.f32 0.1, %v653_v59 }
 0x23c   :  { %v657_v61 = vmax.f32 %v653_v59, %v656_v60 }
 0x23e   :  { %v658_v62 = vpack.c.bf16 %v657_v61, %v657_v61 }
 0x23f   :  { %v654_v63 = vpop.f32.mrf.mxu0 }
 0x240   :  { %1035 = vmatmul.msk.bf16.vlgmr.msra.gmra.mxu1 %vm695_vm1, %v658_v62 }
 0x2bd   :  { %v708_v2 = vpop.f32.mrf.mxu1 }
 0x2be   :  { %v709_v3 = vadd.f32 %v1118_v1, %v708_v2 }
 0x2c0   :  { %v712_v4 = vmul.f32 0.1, %v709_v3 }
 0x2c2   :  { %v713_v5 = vmax.f32 %v709_v3, %v712_v4 }
 0x2c4   :  { %v714_v6 = vpack.c.bf16 %v713_v5, %v713_v5 }
 0x2c5   :  { %v710_v7 = vpop.f32.mrf.mxu1 }
 0x2c6   :  { %1044 = vmatmul.msk.bf16.vlgmr.msrb.gmra.mxu1 %vm122_vm0, %v714_v6 }
 0x343   :  { %v747_v9 = vpop.f32.mrf.mxu1 }
 0x344   :  { %v748_v10 = vadd.f32 %v1119_v8, %v747_v9 }
 0x346   :  { %v751_v11 = vsub.f32 0.0, %v748_v10 }
 0x348   :  { %v752_v12 = vmul.f32 1.442695, %v751_v11 }
 0x34a   :  { %1120 = vpow2.f32 %v752_v12 }
 0x34b   :  { %v749_v13 = vpop.f32.mrf.mxu1 }
 0x350   :  { %v1121_v14 = vpop.eup %1120 }
 0x351   :  { %v754_v15 = vadd.f32 1.0, %v1121_v14 }
 0x353   :  { %1122 = vrcp.f32 %v754_v15  ;;  %v766_v19 = vand.u32 2147483648, %v754_v15  ;;  %v764_v21 = vand.u32 2147483647, %v754_v15  ;;  %vm760_vm3 = vweird.f32 %v754_v15 }
 0x355   :  { %v767_v23 = vor.u32 1.1754944e-38, %v766_v19  ;;  %vm765_vm5 = vcmp.eq.f32.partialorder %v764_v21, 8.507059e+37 }
 0x359   :  { %v1123_v16 = vpop.eup %1122 }
 0x35a   :  { %v756_v17 = vmul.f32 %v1123_v16, %v754_v15  ;;  %vm761_vm2 = vweird.f32 %v1123_v16 }
 0x35b   :  { %vm762_vm4 = vmor %vm760_vm3, %vm761_vm2 }
 0x35c   :  { %v757_v18 = vsub.f32 1.0, %v756_v17 }
 0x35e   :  { %v758_v20 = vmul.f32 %v1123_v16, %v757_v18 }
 0x360   :  { %v759_v22 = vadd.f32 %v1123_v16, %v758_v20 }
 0x362   :  { %v763_v24 = vsel %vm762_vm4, %v1123_v16, %v759_v22 }
 0x363   :  { %v768_v25 = vsel %vm765_vm5, %v767_v23, %v763_v24 }
 0x364   :  { %770 = vst [vmem:[%s1411_s13] sm:$0xff] %v768_v25 }
 0x365   :  { %775 = vsyncpa [#allocation3], 1 }
 0x366   :  { %776 = vsyncpa [#allocation5], 1 }

</bundles_post_ra>
